<compile_context>
chip_gen: v7x
topology: tpu7x:2x2x1
jax: 0.10.0
libtpu: 0.0.40
codegen_flags: <defaults>
</compile_context>

<pallas_src>
import jax
import jax.numpy as jnp
from jax.experimental import pallas as pl
from jax.experimental.pallas import tpu as pltpu

# ---- module hyper-parameters (synthetic, small) --------------------------
B = 2             # batch
T = 8             # sequence length
D = 32            # input_dim (hidden)
DROP_OUT = 0.1    # args.drop_out (identity at inference)
LN_EPS = 1e-5     # torch.nn.LayerNorm default


def _final_connecting_kernel(x_ref, w1_ref, vec_ref, b2_ref, o_ref):
    """One invocation over all B*T rows.

    x_ref   : (N, D) f32  flattened activations, N = B*T          (VMEM)
    w1_ref  : (D, D) f32  Linear1 weight, torch (out, in) layout  (VMEM)
    vec_ref : (4, D) f32  rows = [b1, gamma, beta, w2_row]        (VMEM)
    b2_ref  : (1, 1) f32  Linear2 bias                            (SMEM)
    o_ref   : (N, 1) f32
    """
    x = x_ref[...]                                                   # (N, D)
    w1 = w1_ref[...]                                                 # (D, D) (out, in)

    # Linear(D, D): contract x's feature dim with w1's "in" dim (dim 1) so the
    # MXU takes the transposed operand directly -- no transpose op anywhere.
    h = jax.lax.dot_general(
        x, w1,
        dimension_numbers=(((1,), (1,)), ((), ())),
        preferred_element_type=jnp.float32)                         # (N, D)
    h = h + vec_ref[0:1, :]                                          # + b1

    # LayerNorm over the feature dim: one-pass stats (independent XLU reduces),
    # gamma folded into the rsqrt scale.
    mean = jnp.mean(h, axis=-1, keepdims=True)
    msq = jnp.mean(h * h, axis=-1, keepdims=True)
    var = msq - mean * mean
    scale = jax.lax.rsqrt(var + LN_EPS) * vec_ref[1:2, :]            # gamma folded
    h = (h - mean) * scale + vec_ref[2:3, :]                         # + beta

    # Dropout is identity at inference.
    # TODO(synk): training-mode stochastic dropout (pltpu.prng_*) not implemented.
    h = jnp.maximum(h, 0.0)                                          # ReLU (VPU)

    # Linear(D, 1): VPU multiply + XLU lane reduce instead of a near-empty MXU push.
    out = jnp.sum(h * vec_ref[3:4, :], axis=-1, keepdims=True) + b2_ref[0, 0]
    o_ref[...] = out.astype(o_ref.dtype)


def prepare_params(w1, b1, gamma, beta, w2, b2):
    """Pack parameters ONCE (outside the jitted/step path).

    Keeps w1 in torch (out, in) layout (kernel uses trans_b contraction), stacks
    the four per-feature vectors into a single (4, D) operand, and reshapes b2 to
    a (1, 1) SMEM scalar.  No transposes on the hot path.
    """
    vecs = jnp.stack(
        [b1, gamma, beta, w2.reshape(-1)], axis=0).astype(jnp.float32)   # (4, D)
    return (jnp.asarray(w1, jnp.float32),                                # (D, D)
            vecs,
            jnp.asarray(b2, jnp.float32).reshape(1, 1))                  # (1, 1)


@jax.jit
def final_connecting(x, w1, vecs, b2):
    """x: (B, T, D) f32, params from prepare_params -> (B, T, 1) f32."""
    Bx, Tx, Dx = x.shape
    n = Bx * Tx
    vspec = pl.BlockSpec(memory_space=pltpu.MemorySpace.VMEM)
    sspec = pl.BlockSpec(memory_space=pltpu.MemorySpace.SMEM)
    out = pl.pallas_call(
        _final_connecting_kernel,
        out_shape=jax.ShapeDtypeStruct((n, 1), jnp.float32),
        in_specs=[vspec, vspec, vspec, sspec],
        out_specs=vspec,
    )(x.reshape(n, Dx), w1, vecs, b2)
    return out.reshape(Bx, Tx, 1)


def _reference(x, w1, b1, gamma, beta, w2, b2):
    """Pure-JAX replica of the torch module at eval time."""
    h = x @ w1.T + b1
    mean = h.mean(-1, keepdims=True)
    var = ((h - mean) ** 2).mean(-1, keepdims=True)
    h = (h - mean) / jnp.sqrt(var + LN_EPS) * gamma + beta
    h = jnp.maximum(h, 0.0)                     # Dropout (eval) is identity
    return h @ w2.T + b2


if __name__ == "__main__":
    key = jax.random.PRNGKey(0)
    kx, kw1, kb1, kg, kbe, kw2, kb2 = jax.random.split(key, 7)

    # Input activations.
    x = jax.random.normal(kx, (B, T, D), jnp.float32)

    # nn.Linear(D, D) init range, torch (out, in) layout.
    bound = 1.0 / jnp.sqrt(jnp.float32(D))
    w1 = jax.random.uniform(kw1, (D, D), jnp.float32, -bound, bound)
    b1 = jax.random.uniform(kb1, (D,), jnp.float32, -bound, bound)

    # nn.LayerNorm(D): default gamma=1, beta=0; perturb to exercise affine.
    gamma = 1.0 + 0.1 * jax.random.normal(kg, (D,), jnp.float32)
    beta = 0.1 * jax.random.normal(kbe, (D,), jnp.float32)

    # nn.Linear(D, 1), torch (out, in) layout.
    w2 = jax.random.uniform(kw2, (1, D), jnp.float32, -bound, bound)
    b2 = jax.random.uniform(kb2, (1,), jnp.float32, -bound, bound)

    # One-time parameter packing (constants per forward pass).
    w1_p, vecs_p, b2_p = prepare_params(w1, b1, gamma, beta, w2, b2)

    out = jax.block_until_ready(final_connecting(x, w1_p, vecs_p, b2_p))
    ref = _reference(x, w1, b1, gamma, beta, w2, b2)

    assert out.shape == (B, T, 1)
    assert jnp.allclose(out, ref, atol=1e-4, rtol=1e-4), (
        float(jnp.max(jnp.abs(out - ref))))

    print("KERNEL_OK")
</pallas_src>

<mosaic_0001>
module attributes {stable_mosaic.version = 11 : i64} {
  func.func @_final_connecting_kernel(%arg0: memref<16x32xf32, #tpu.memory_space<vmem>>, %arg1: memref<32x32xf32, #tpu.memory_space<vmem>>, %arg2: memref<4x32xf32, #tpu.memory_space<vmem>>, %arg3: memref<1x1xf32, #tpu.memory_space<smem>>, %arg4: memref<16x1xf32, #tpu.memory_space<vmem>>) attributes {dimension_semantics = [], scalar_prefetch = 0 : i64, scratch_operands = 0 : i64, tpu.core_type = #tpu.core_type<tc>} {
    %c0 = arith.constant 0 : index
    %c0_0 = arith.constant 0 : index
    %0 = vector.load %arg0[%c0, %c0_0] : memref<16x32xf32, #tpu.memory_space<vmem>>, vector<16x32xf32>
    %c0_1 = arith.constant 0 : index
    %c0_2 = arith.constant 0 : index
    %1 = vector.load %arg1[%c0_1, %c0_2] : memref<32x32xf32, #tpu.memory_space<vmem>>, vector<32x32xf32>
    %cst = arith.constant dense<0.000000e+00> : vector<16x32xf32>
    %2 = tpu.matmul %0, %1, %cst {dimension_numbers = #tpu.dot_dimension_numbers<[1], [1], [0], [0], [0, 0, 1, 0], [], []>} : vector<16x32xf32>, vector<32x32xf32>, vector<16x32xf32> -> vector<16x32xf32>
    %c0_3 = arith.constant 0 : index
    %c0_4 = arith.constant 0 : index
    %3 = vector.load %arg2[%c0_3, %c0_4] : memref<4x32xf32, #tpu.memory_space<vmem>>, vector<1x32xf32>
    %4 = vector.broadcast %3 : vector<1x32xf32> to vector<16x32xf32>
    %5 = arith.addf %2, %4 : vector<16x32xf32>
    %cst_5 = arith.constant dense<0.000000e+00> : vector<16xf32>
    %6 = vector.multi_reduction <add>, %5, %cst_5 [1] : vector<16x32xf32> to vector<16xf32>
    %7 = vector.shape_cast %6 : vector<16xf32> to vector<16x1xf32>
    %cst_6 = arith.constant 3.200000e+01 : f32
    %8 = vector.broadcast %cst_6 : f32 to vector<16x1xf32>
    %9 = arith.divf %7, %8 : vector<16x1xf32>
    %10 = arith.mulf %5, %5 : vector<16x32xf32>
    %cst_7 = arith.constant dense<0.000000e+00> : vector<16xf32>
    %11 = vector.multi_reduction <add>, %10, %cst_7 [1] : vector<16x32xf32> to vector<16xf32>
    %12 = vector.shape_cast %11 : vector<16xf32> to vector<16x1xf32>
    %cst_8 = arith.constant 3.200000e+01 : f32
    %13 = vector.broadcast %cst_8 : f32 to vector<16x1xf32>
    %14 = arith.divf %12, %13 : vector<16x1xf32>
    %15 = arith.mulf %9, %9 : vector<16x1xf32>
    %16 = arith.subf %14, %15 : vector<16x1xf32>
    %cst_9 = arith.constant 9.99999974E-6 : f32
    %17 = vector.broadcast %cst_9 : f32 to vector<16x1xf32>
    %18 = arith.addf %16, %17 : vector<16x1xf32>
    %19 = math.rsqrt %18 : vector<16x1xf32>
    %c1 = arith.constant 1 : index
    %c0_10 = arith.constant 0 : index
    %20 = vector.load %arg2[%c1, %c0_10] : memref<4x32xf32, #tpu.memory_space<vmem>>, vector<1x32xf32>
    %21 = vector.broadcast %19 : vector<16x1xf32> to vector<16x32xf32>
    %22 = vector.broadcast %20 : vector<1x32xf32> to vector<16x32xf32>
    %23 = arith.mulf %21, %22 : vector<16x32xf32>
    %24 = vector.broadcast %9 : vector<16x1xf32> to vector<16x32xf32>
    %25 = arith.subf %5, %24 : vector<16x32xf32>
    %26 = arith.mulf %25, %23 : vector<16x32xf32>
    %c2 = arith.constant 2 : index
    %c0_11 = arith.constant 0 : index
    %27 = vector.load %arg2[%c2, %c0_11] : memref<4x32xf32, #tpu.memory_space<vmem>>, vector<1x32xf32>
    %28 = vector.broadcast %27 : vector<1x32xf32> to vector<16x32xf32>
    %29 = arith.addf %26, %28 : vector<16x32xf32>
    %cst_12 = arith.constant 0.000000e+00 : f32
    %30 = vector.broadcast %cst_12 : f32 to vector<16x32xf32>
    %31 = arith.maximumf %29, %30 : vector<16x32xf32>
    %c3 = arith.constant 3 : index
    %c0_13 = arith.constant 0 : index
    %32 = vector.load %arg2[%c3, %c0_13] : memref<4x32xf32, #tpu.memory_space<vmem>>, vector<1x32xf32>
    %33 = vector.broadcast %32 : vector<1x32xf32> to vector<16x32xf32>
    %34 = arith.mulf %31, %33 : vector<16x32xf32>
    %cst_14 = arith.constant dense<0.000000e+00> : vector<16xf32>
    %35 = vector.multi_reduction <add>, %34, %cst_14 [1] : vector<16x32xf32> to vector<16xf32>
    %36 = vector.shape_cast %35 : vector<16xf32> to vector<16x1xf32>
    %c0_15 = arith.constant 0 : index
    %c0_16 = arith.constant 0 : index
    %37 = memref.load %arg3[%c0_15, %c0_16] : memref<1x1xf32, #tpu.memory_space<smem>>
    %38 = vector.broadcast %37 : f32 to vector<16x1xf32>
    %39 = arith.addf %36, %38 : vector<16x1xf32>
    %c0_17 = arith.constant 0 : index
    %c0_18 = arith.constant 0 : index
    %40 = vector.load %arg4[%c0_17, %c0_18] : memref<16x1xf32, #tpu.memory_space<vmem>>, vector<16x1xf32>
    tpu.vector_store %arg4[%c0_17, %c0_18], %39 {strides = array<i32>} : memref<16x1xf32, #tpu.memory_space<vmem>>, vector<16x1xf32>,
    return
  }
}

</mosaic_0001>

<bundles_post_ra>
// kernel: final_connecting.1
= control target key start
LH: loop header
LB: loop body
LE: loop exit
PB: predicated region body
PF: predicated region fallthrough
CT: control target
= control target key end

     0   :  { %10 = vsyncpa [#allocation4], 0  ;;  %s403_s0 = inlined_call_operand.hbm [shape: f32[16,32], index: 0, kind: input, shape index: {}]   ;;  %s404_s1 = inlined_call_operand.hbm [shape: f32[32,32], index: 1, kind: input, shape index: {}]   ;;  %s405_s2 = inlined_call_operand.vmem [shape: f32[4,32], index: 2, kind: input, shape index: {}]   ;;  %s406_s3 = inlined_call_operand.<no memory space> [shape: f32[1,1], index: 3, kind: input, shape index: {}]   ;;  %s407_s4 = inlined_call_operand.vmem [shape: f32[16,1], index: 4, kind: output, shape index: {}]  }
   0x1   :  { %11 = vsyncpa [#allocation6], 0  ;;  %s319_s15 = smov [#allocation3]   ;;  %s271_s19 = scalar_lea.hbm %s403_s0, 256 }
   0x2   :  { %s17_s16 = sshll.u32 %s319_s15, 4  ;;  %p272_p0 = scmp.ne.s32.totalorder %s403_s0, %s271_s19  ;;  %s18_s16 = int_to_ptr.vmem [resolvable:$true] %s17_s16 }
   0x3   :  { %p275_p1 = scmp.lt.u32.totalorder %s271_s19, %s403_s0 }
   0x5   :  { %p277_p2 = pnand %p275_p1, %p272_p0 }
   0x7   :  { %280 = shalt.err (!%p277_p2)
}
   0x8   :  { %s281_s24 = scalar_lea.vmem %s18_s16, 256  ;;  %p286_p4 = scmp.lt.s32.totalorder %s18_s16, %s18_s16 }
   0x9   :  { %p282_p3 = scmp.ne.s32.totalorder %s18_s16, %s281_s24  ;;  %p287_p5 = scmp.lt.s32.totalorder %s281_s24, %s281_s24 }
   0xb   :  { %p288_p6 = por %p287_p5, %p286_p4 }
   0xd   :  { %p289_p7 = pnand %p288_p6, %p282_p3 }
   0xf   :  { %292 = shalt.err (!%p289_p7)
}
  0x10   :  { %s320_s25 = smov 128   ;;  %s321_s26 = smov 8  }
  0x11   :  { %23 = dma.hbm_to_vmem [thread:$0]  %s403_s0, 256, %s18_s16, [#allocation4], %s320_s25, %s320_s25, %s321_s26  }
  0x12   :  { %s322_s29 = smov [#allocation5]   ;;  %s293_s7 = scalar_lea.hbm %s404_s1, 512 }
  0x13   :  { %s29_s30 = sshll.u32 %s322_s29, 4  ;;  %p294_p8 = scmp.ne.s32.totalorder %s404_s1, %s293_s7  ;;  %s30_s30 = int_to_ptr.vmem [resolvable:$true] %s29_s30 }
  0x14   :  { %p297_p9 = scmp.lt.u32.totalorder %s293_s7, %s404_s1 }
  0x16   :  { %p299_p10 = pnand %p297_p9, %p294_p8 }
  0x18   :  { %302 = shalt.err (!%p299_p10)
}
  0x19   :  { %s303_s12 = scalar_lea.vmem %s30_s30, 512  ;;  %p308_p12 = scmp.lt.s32.totalorder %s30_s30, %s30_s30 }
  0x1a   :  { %p304_p11 = scmp.ne.s32.totalorder %s30_s30, %s303_s12  ;;  %p309_p13 = scmp.lt.s32.totalorder %s303_s12, %s303_s12 }
  0x1c   :  { %p310_p0 = por %p309_p13, %p308_p12 }
  0x1e   :  { %p311_p1 = pnand %p310_p0, %p304_p11 }
  0x20   :  { %314 = shalt.err (!%p311_p1)
}
  0x21   :  { %35 = dma.hbm_to_vmem [thread:$0]  %s404_s1, 512, %s30_s30, [#allocation6], %s320_s25, %s320_s25, %s321_s26  }
  0x22   :  { %315 = dma.done.wait [#allocation4], 256  }
  0x23   :  { %316 = vsyncadd [#allocation4], 4294967040 }
  0x24   :  { %317 = dma.done.wait [#allocation6], 512  }
  0x25   :  { %318 = vsyncadd [#allocation6], 4294966784  ;;  %vm57_vm0 = vcmask 261120   ;;  %v48_v0 = vld [vmem:[#allocation5] sm:$0xff]  ;;  %v49_v1 = vld [vmem:[#allocation5 + $0x8] sm:$0xff]  ;;  %v212_v52 = vstv %s406_s3  ;;  %vm215_vm2 = vcmask 7168  }
  0x26   :  { %vm252_vm1 = vmpackc.low %vm57_vm0, %vm57_vm0  ;;  %v50_v2 = vld [vmem:[#allocation5 + $0x10] sm:$0xff]  ;;  %v251_v3 = vpack.c.bf16 %v49_v1, %v48_v0  ;;  %v51_v4 = vld [vmem:[#allocation5 + $0x18] sm:$0xff] }
  0x27   :  { %v46_v5 = vld [vmem:[#allocation3] sm:$0xff]  ;;  %v257_v6 = vpack.c.bf16 %v51_v4, %v50_v2  ;;  %v47_v7 = vld [vmem:[#allocation3 + $0x8] sm:$0xff] }
  0x28   :  { %248 = vmatprep.mubr.msk.f32.mxu0 %vm57_vm0, %v46_v5  ;;  %253 = vmatprep.subr.msk.bf16.mxu0 %vm252_vm1, %v251_v3  ;;  %v224_v8 = vld [vmem:[%s405_s2] ss:$0 sm:$0xff]  ;;  %v231_v33 = vld [vmem:[%s405_s2 + $0x1] ss:$0 sm:$0xff]  ;;  %v232_v37 = vld [vmem:[%s405_s2 + $0x2] ss:$0 sm:$0xff] }
  0x29   :  { %256 = vmatpush3.bf16.xpose.msk.msra.mxu0 %vm252_vm1, %v251_v3  ;;  %v233_v43 = vld [vmem:[%s405_s2 + $0x3] ss:$0 sm:$0xff] }
  0x2a   :  { %259 = vmatprep.subr.msk.bf16.mxu0 %vm252_vm1, %v257_v6 }
  0x31   :  { %262 = vmatpush3.bf16.xpose.msk.msra.mxu0 %vm252_vm1, %v257_v6 }
  0x38   :  { %249 = vmatmul.mubr.msk.f32.vlgmr.msra.gmra.mrb[0].mxu0 %vm57_vm0, %v47_v7 }
 0x10b   :  { %v250_v9 = vpop.f32.mrb[0].mxu0 }
 0x10c   :  { %v142_v10 = vpop.f32.mrb[1].mxu0  ;;  %v148_v11 = vadd.f32 %v250_v9, %v224_v8 }
 0x10d   :  { %v143_v12 = vadd.f32 %v224_v8, %v142_v10 }
 0x10e   :  { %v161_v16 = vmul.f32 %v148_v11, %v148_v11  ;;  %v154_v17 = vsel %vm57_vm0, %v148_v11, 0.0 }
 0x10f   :  { %v151_v13 = vsel %vm57_vm0, %v143_v12, 0.0  ;;  %v160_v14 = vmul.f32 %v143_v12, %v143_v12 }
 0x110   :  { %152 = vadd.xlane.f32.xlu0 %v151_v13  ;;  %v165_v18 = vsel %vm57_vm0, %v161_v16, 0.0 }
 0x111   :  { %v162_v15 = vsel %vm57_vm0, %v160_v14, 0.0 }
 0x112   :  { %163 = vadd.xlane.f32.xlu1 %v162_v15 }
 0x114   :  { %155 = vadd.xlane.f32.xlu0 %v154_v17 }
 0x116   :  { %166 = vadd.xlane.f32.xlu1 %v165_v18 }
 0x19d   :  { %v153_v19 = vpop.xlane.xlu0 %152 }
 0x19e   :  { %v158_v20 = vmul.f32 0.03125, %v153_v19 }
 0x19f   :  { %v164_v21 = vpop.xlane.xlu1 %163 }
 0x1a0   :  { %v170_v22 = vmul.f32 %v158_v20, %v158_v20  ;;  %v168_v23 = vmul.f32 0.03125, %v164_v21  ;;  %v185_v35 = vsub.f32 %v143_v12, %v158_v20 }
 0x1a1   :  { %v156_v24 = vpop.xlane.xlu0 %155 }
 0x1a2   :  { %v172_v25 = vsub.f32 %v168_v23, %v170_v22  ;;  %v159_v26 = vmul.f32 0.03125, %v156_v24 }
 0x1a3   :  { %v167_v27 = vpop.xlane.xlu1 %166 }
 0x1a4   :  { %v174_v28 = vadd.f32 1e-05, %v172_v25  ;;  %v171_v29 = vmul.f32 %v159_v26, %v159_v26  ;;  %v169_v30 = vmul.f32 0.03125, %v167_v27  ;;  %v186_v40 = vsub.f32 %v148_v11, %v159_v26 }
 0x1a6   :  { %267 = vrsqrt.f32 %v174_v28  ;;  %v173_v31 = vsub.f32 %v169_v30, %v171_v29 }
 0x1a8   :  { %v175_v32 = vadd.f32 1e-05, %v173_v31 }
 0x1aa   :  { %269 = vrsqrt.f32 %v175_v32 }
 0x1b0   :  { %v268_v34 = vpop.eup %267 }
 0x1b1   :  { %v183_v36 = vmul.f32 %v268_v34, %v231_v33 }
 0x1b3   :  { %v187_v38 = vmul.f32 %v185_v35, %v183_v36 }
 0x1b4   :  { %v270_v39 = vpop.eup %269 }
 0x1b5   :  { %v194_v41 = vadd.f32 %v232_v37, %v187_v38  ;;  %v184_v42 = vmul.f32 %v270_v39, %v231_v33 }
 0x1b7   :  { %v196_v44 = vmax.f32 %v194_v41, 0.0  ;;  %v188_v45 = vmul.f32 %v186_v40, %v184_v42 }
 0x1b9   :  { %v203_v46 = vmul.f32 %v233_v43, %v196_v44  ;;  %v195_v47 = vadd.f32 %v232_v37, %v188_v45 }
 0x1bb   :  { %v205_v48 = vsel %vm57_vm0, %v203_v46, 0.0  ;;  %v197_v49 = vmax.f32 %v195_v47, 0.0 }
 0x1bc   :  { %206 = vadd.xlane.f32.xlu0 %v205_v48 }
 0x1bd   :  { %v204_v50 = vmul.f32 %v233_v43, %v197_v49 }
 0x1bf   :  { %v208_v51 = vsel %vm57_vm0, %v204_v50, 0.0 }
 0x1c0   :  { %209 = vadd.xlane.f32.xlu1 %v208_v51 }
 0x249   :  { %v207_v53 = vpop.xlane.xlu0 %206 }
 0x24a   :  { %v213_v54 = vadd.f32 %v212_v52, %v207_v53 }
 0x24c   :  { %216 = vst.msk [vmem:[%s407_s4] sm:$0xff] %vm215_vm2, %v213_v54 }
 0x24d   :  { %v210_v55 = vpop.xlane.xlu1 %209 }
 0x24e   :  { %v214_v56 = vadd.f32 %v212_v52, %v210_v55 }
 0x250   :  { %217 = vst.msk [vmem:[%s407_s4 + $0x8] sm:$0xff] %vm215_vm2, %v214_v56 }
 0x251   :  { %222 = vsyncpa [#allocation4], 1 }
 0x252   :  { %223 = vsyncpa [#allocation6], 1 }

</bundles_post_ra>
